<compile_context>
chip_gen: v6e
topology: v6e:2x2x1
jax: 0.10.0
libtpu: 0.0.40
codegen_flags: <defaults>
</compile_context>

<pallas_src>
import math
import jax
import jax.numpy as jnp
from jax.experimental import pallas as pl
from jax.experimental.pallas import tpu as pltpu


def _round_up(x, m):
    return ((x + m - 1) // m) * m


def _pick_d_tile(D, max_tn=2048):
    """Choose (tn, D_pad): lane-dense output tile width and padded D.

    D_pad is a multiple of tn; tn is a multiple of 128 (256 when tiling)."""
    d128 = _round_up(D, 128)
    if d128 <= max_tn:
        return d128, d128                      # single D tile, full width
    D_pad = _round_up(D, 256)                  # MXU-friendly padding
    units = D_pad // 256
    tn_units = 1
    for d in range(min(units, max_tn // 256), 0, -1):
        if units % d == 0:                     # tn must divide D_pad
            tn_units = d
            break
    return tn_units * 256, D_pad


def _vmem_limit_bytes():
    try:
        cap = pltpu.get_tpu_info().vmem_capacity_bytes
        return min(int(cap) * 3 // 4, 100 << 20)   # ~96 MiB v5e/v6e, 48 MiB v7x
    except Exception:
        return 48 << 20                            # safe everywhere


def fea2weight_kernel(x_ref, w1_ref, b1_ref, w2_ref, b2_ref, o_ref):
    # First linear: tiny contraction (K = feature_num).  Recomputed per D tile
    # (<1-6% of FLOPs) so the row and column grid axes stay independent.
    x = x_ref[...].astype(jnp.bfloat16)
    h = jnp.dot(x, w1_ref[...], preferred_element_type=jnp.float32)
    h = jnp.maximum(h + b1_ref[...], 0.0)          # bias + ReLU in f32 (VPU filler)
    # Second linear: K = 256 exactly fills the 256-wide MXU; bf16 operands,
    # f32 accumulation.
    out = jnp.dot(h.astype(w2_ref.dtype), w2_ref[...],
                  preferred_element_type=jnp.float32)
    o_ref[...] = (out + b2_ref[...]).astype(o_ref.dtype)


def prepare_fea2weight_params(w1, b1, w2, b2, *, max_tn=2048):
    """One-time weight preprocessing, hoisted out of the per-call hot path.

    Casts W1/W2 to bf16 and zero-pads W2/b2 columns to a lane-dense multiple
    of the D tile.  Call once at module init; pass the result to fea2weight().
    """
    w1 = jnp.asarray(w1)
    w2 = jnp.asarray(w2)
    F, H = w1.shape
    D = w2.shape[1]
    tn, D_pad = _pick_d_tile(D, max_tn)

    b1 = jnp.asarray(b1, jnp.float32).reshape(1, H)
    b2 = jnp.asarray(b2, jnp.float32).reshape(1, D)
    if D_pad != D:
        w2 = jnp.pad(w2, ((0, 0), (0, D_pad - D)))
        b2 = jnp.pad(b2, ((0, 0), (0, D_pad - D)))

    return dict(
        w1=w1.astype(jnp.bfloat16), b1=b1,
        w2=w2.astype(jnp.bfloat16), b2=b2,
        F=F, H=H, D=D, D_pad=D_pad, tn=tn,
    )


def fea2weight(x, params, *, tm=None, out_dtype=jnp.float32):
    """Fused MLP: ReLU(x @ W1 + b1) @ W2 + b2.

    x: (N, F) float32.  params: output of prepare_fea2weight_params().
    Returns (N, D) in out_dtype (default float32, matching the PyTorch module;
    bf16 optional to halve the dominant HBM write stream).
    """
    N, F = x.shape
    assert F == params["F"], "feature dim mismatch"
    H, D, D_pad, tn = params["H"], params["D"], params["D_pad"], params["tn"]
    w1, b1, w2, b2 = params["w1"], params["b1"], params["w2"], params["b2"]

    # ---- row tile: 256 (full MXU rows, >=4 grid steps/core on mid/large N);
    #      for small N use a single padded step to avoid wasted padded rows.
    if tm is None:
        tm = _round_up(max(N, 8), 8) if N <= 256 else 256
    tm = max(8, _round_up(tm, 8))

    N_pad = _round_up(N, tm)
    if N_pad != N:
        x = jnp.pad(x, ((0, N_pad - N), (0, 0)))

    nd = D_pad // tn
    nm = N_pad // tm
    # D axis OUTER, rows INNER: the (H, tn) W2 tile stays resident across the
    # inner row loop, so W2 is DMA'd from HBM exactly once.
    grid = (nd, nm)

    x_bytes = x.size * jnp.asarray(x).dtype.itemsize
    flops = 2 * N_pad * (F * H * nd + H * D_pad)
    bytes_accessed = (x_bytes * nd + w1.size * 2 + b1.size * 4
                      + w2.size * 2 + b2.size * 4
                      + N_pad * D_pad * jnp.dtype(out_dtype).itemsize)

    out = pl.pallas_call(
        fea2weight_kernel,
        out_shape=jax.ShapeDtypeStruct((N_pad, D_pad), out_dtype),
        grid_spec=pltpu.PrefetchScalarGridSpec(
            num_scalar_prefetch=0,
            grid=grid,
            in_specs=[
                pl.BlockSpec((tm, F), lambda j, i: (i, 0)),     # x rows tile
                pl.BlockSpec((F, H), lambda j, i: (0, 0)),      # W1 resident (tiny)
                pl.BlockSpec((1, H), lambda j, i: (0, 0)),      # b1 resident
                pl.BlockSpec((H, tn), lambda j, i: (0, j)),     # W2 column tile
                pl.BlockSpec((1, tn), lambda j, i: (0, j)),     # b2 column tile
            ],
            out_specs=pl.BlockSpec((tm, tn), lambda j, i: (i, j)),
        ),
        compiler_params=pltpu.CompilerParams(
            dimension_semantics=("parallel", "parallel"),
            vmem_limit_bytes=_vmem_limit_bytes()),
        cost_estimate=pl.CostEstimate(
            flops=flops, transcendentals=0, bytes_accessed=bytes_accessed),
    )(x, w1, b1, w2, b2)

    # slice row / lane padding back off
    return out[:N, :D]


def init_linear_params(key, in_features, out_features, dtype=jnp.float32):
    """Init mirroring PyTorch nn.Linear defaults (uniform(+-1/sqrt(fan_in)))."""
    kw, kb = jax.random.split(key)
    bound = 1.0 / math.sqrt(in_features)
    # weight stored as (in_features, out_features) = PyTorch weight.T
    w = jax.random.uniform(kw, (in_features, out_features), dtype,
                           minval=-bound, maxval=bound)
    b = jax.random.uniform(kb, (1, out_features), dtype,
                           minval=-bound, maxval=bound)
    return w, b


if __name__ == "__main__":
    feature_num = 8          # input feature dim of the meta MLP
    hidden = 256

    def ref_bf16(x, w1, b1, w2, b2):
        h = jnp.maximum(
            jnp.dot(x.astype(jnp.bfloat16), w1.astype(jnp.bfloat16),
                    preferred_element_type=jnp.float32) + b1.reshape(1, -1), 0.0)
        return jnp.dot(h.astype(jnp.bfloat16), w2.astype(jnp.bfloat16),
                       preferred_element_type=jnp.float32) + b2.reshape(1, -1)

    def run_case(key, N, inC, outC, ksz):
        D = ksz * ksz * inC * outC
        kx, k1, k2 = jax.random.split(key, 3)
        x = jax.random.normal(kx, (N, feature_num), jnp.float32)
        w1, b1 = init_linear_params(k1, feature_num, hidden)
        w2, b2 = init_linear_params(k2, hidden, D)

        params = prepare_fea2weight_params(w1, b1, w2, b2)   # hoisted prep
        out = jax.block_until_ready(fea2weight(x, params))
        assert out.shape == (N, D)

        # Tight check vs a bf16-operand / f32-accumulate consistent reference
        rb = ref_bf16(x, w1, b1, w2, b2)
        assert jnp.allclose(out, rb, atol=2e-2, rtol=2e-2), \
            f"mismatch vs bf16-consistent reference (N={N}, D={D})"
        # Loose check vs the pure-f32 PyTorch-equivalent reference
        rf = jnp.maximum(x @ w1 + b1.reshape(1, -1), 0.0) @ w2 + b2.reshape(1, -1)
        assert jnp.allclose(out, rf, atol=5e-2, rtol=5e-2), \
            f"mismatch vs f32 reference (N={N}, D={D})"

    key = jax.random.PRNGKey(0)
    k_small, k_mid = jax.random.split(key)

    # Small, module-consistent shapes: inC=4, outC=3, 3x3 kernel -> D=108
    run_case(k_small, N=16, inC=4, outC=3, ksz=3)
    # Moderate case exercising row tiling, D padding and the 2-D grid:
    # inC=outC=8, 3x3 -> D=576 (padded to 640), N=384 -> 2 row steps of 256
    run_case(k_mid, N=384, inC=8, outC=8, ksz=3)

    print("KERNEL_OK")
</pallas_src>

<mosaic_0001>
module attributes {stable_mosaic.version = 11 : i64} {
  func.func @fea2weight_kernel(%arg0: i32, %arg1: i32, %arg2: memref<16x8xf32, #tpu.memory_space<vmem>>, %arg3: memref<8x256xbf16, #tpu.memory_space<vmem>>, %arg4: memref<1x256xf32, #tpu.memory_space<vmem>>, %arg5: memref<256x128xbf16, #tpu.memory_space<vmem>>, %arg6: memref<1x128xf32, #tpu.memory_space<vmem>>, %arg7: memref<16x128xf32, #tpu.memory_space<vmem>>) attributes {dimension_semantics = [#tpu.dimension_semantics<parallel>, #tpu.dimension_semantics<parallel>], iteration_bounds = array<i64: 1, 1>, scalar_prefetch = 0 : i64, scratch_operands = 0 : i64, tpu.core_type = #tpu.core_type<tc>, window_params = [{transform_indices = @transform_0, window_bounds = array<i64: 16, 8>}, {pipeline_mode = #tpu.pipeline_mode<synchronous>, transform_indices = @transform_1, window_bounds = array<i64: 8, 256>}, {pipeline_mode = #tpu.pipeline_mode<synchronous>, transform_indices = @transform_2, window_bounds = array<i64: 1, 256>}, {transform_indices = @transform_3, window_bounds = array<i64: 256, 128>}, {transform_indices = @transform_4, window_bounds = array<i64: 1, 128>}, {transform_indices = @transform_5, window_bounds = array<i64: 16, 128>}]} {
    %c0 = arith.constant 0 : index
    %c0_0 = arith.constant 0 : index
    %0 = vector.load %arg2[%c0, %c0_0] : memref<16x8xf32, #tpu.memory_space<vmem>>, vector<16x8xf32>
    %1 = arith.truncf %0 : vector<16x8xf32> to vector<16x8xbf16>
    %c0_1 = arith.constant 0 : index
    %c0_2 = arith.constant 0 : index
    %2 = vector.load %arg3[%c0_1, %c0_2] : memref<8x256xbf16, #tpu.memory_space<vmem>>, vector<8x256xbf16>
    %cst = arith.constant dense<0.000000e+00> : vector<16x256xf32>
    %3 = tpu.matmul %1, %2, %cst {dimension_numbers = #tpu.dot_dimension_numbers<[1], [0], [0], [1], [0, 0, 1, 1], [], []>} : vector<16x8xbf16>, vector<8x256xbf16>, vector<16x256xf32> -> vector<16x256xf32>
    %c0_3 = arith.constant 0 : index
    %c0_4 = arith.constant 0 : index
    %4 = vector.load %arg4[%c0_3, %c0_4] : memref<1x256xf32, #tpu.memory_space<vmem>>, vector<1x256xf32>
    %5 = vector.broadcast %4 : vector<1x256xf32> to vector<16x256xf32>
    %6 = arith.addf %3, %5 : vector<16x256xf32>
    %cst_5 = arith.constant 0.000000e+00 : f32
    %7 = vector.broadcast %cst_5 : f32 to vector<16x256xf32>
    %8 = arith.maximumf %6, %7 : vector<16x256xf32>
    %9 = arith.truncf %8 : vector<16x256xf32> to vector<16x256xbf16>
    %c0_6 = arith.constant 0 : index
    %c0_7 = arith.constant 0 : index
    %10 = vector.load %arg5[%c0_6, %c0_7] : memref<256x128xbf16, #tpu.memory_space<vmem>>, vector<256x128xbf16>
    %cst_8 = arith.constant dense<0.000000e+00> : vector<16x128xf32>
    %11 = tpu.matmul %9, %10, %cst_8 {dimension_numbers = #tpu.dot_dimension_numbers<[1], [0], [0], [1], [0, 0, 1, 1], [], []>} : vector<16x256xbf16>, vector<256x128xbf16>, vector<16x128xf32> -> vector<16x128xf32>
    %c0_9 = arith.constant 0 : index
    %c0_10 = arith.constant 0 : index
    %12 = vector.load %arg6[%c0_9, %c0_10] : memref<1x128xf32, #tpu.memory_space<vmem>>, vector<1x128xf32>
    %13 = vector.broadcast %12 : vector<1x128xf32> to vector<16x128xf32>
    %14 = arith.addf %11, %13 : vector<16x128xf32>
    %c0_11 = arith.constant 0 : index
    %c0_12 = arith.constant 0 : index
    %15 = vector.load %arg7[%c0_11, %c0_12] : memref<16x128xf32, #tpu.memory_space<vmem>>, vector<16x128xf32>
    tpu.vector_store %arg7[%c0_11, %c0_12], %14 {strides = array<i32>} : memref<16x128xf32, #tpu.memory_space<vmem>>, vector<16x128xf32>,
    return
  }
  func.func @transform_0(%arg0: i32, %arg1: i32) -> (i32, i32) {
    %c0_i32 = arith.constant 0 : i32
    %c0_i32_0 = arith.constant 0 : i32
    return %arg1, %c0_i32 : i32, i32
  }
  func.func @transform_1(%arg0: i32, %arg1: i32) -> (i32, i32) {
    %c0_i32 = arith.constant 0 : i32
    %c0_i32_0 = arith.constant 0 : i32
    %c0_i32_1 = arith.constant 0 : i32
    return %c0_i32, %c0_i32_0 : i32, i32
  }
  func.func @transform_2(%arg0: i32, %arg1: i32) -> (i32, i32) {
    %c0_i32 = arith.constant 0 : i32
    %c0_i32_0 = arith.constant 0 : i32
    %c0_i32_1 = arith.constant 0 : i32
    return %c0_i32, %c0_i32_0 : i32, i32
  }
  func.func @transform_3(%arg0: i32, %arg1: i32) -> (i32, i32) {
    %c0_i32 = arith.constant 0 : i32
    %c0_i32_0 = arith.constant 0 : i32
    return %c0_i32, %arg0 : i32, i32
  }
  func.func @transform_4(%arg0: i32, %arg1: i32) -> (i32, i32) {
    %c0_i32 = arith.constant 0 : i32
    %c0_i32_0 = arith.constant 0 : i32
    return %c0_i32, %arg0 : i32, i32
  }
  func.func @transform_5(%arg0: i32, %arg1: i32) -> (i32, i32) {
    %c0_i32 = arith.constant 0 : i32
    return %arg1, %arg0 : i32, i32
  }
}

</mosaic_0001>

<bundles_post_ra>
// kernel: tpu_custom_call.1
= control target key start
LH: loop header
LB: loop body
LE: loop exit
PB: predicated region body
PF: predicated region fallthrough
CT: control target
= control target key end

     0   :  { %10 = vsyncpa [#allocation3], 0  ;;  %s482_s0 = inlined_call_operand.vmem [shape: f32[16,8], index: 0, kind: input, shape index: {}]   ;;  %s483_s1 = inlined_call_operand.vmem [shape: bf16[8,256], index: 1, kind: input, shape index: {}]   ;;  %s484_s2 = inlined_call_operand.vmem [shape: f32[1,256], index: 2, kind: input, shape index: {}]   ;;  %s485_s3 = inlined_call_operand.hbm [shape: bf16[256,128], index: 3, kind: input, shape index: {}]   ;;  %s486_s4 = inlined_call_operand.vmem [shape: f32[1,128], index: 4, kind: input, shape index: {}]   ;;  %s487_s5 = inlined_call_operand.hbm [shape: f32[16,128], index: 5, kind: output, shape index: {}]  }
   0x1   :  { %11 = vsyncpa [#allocation4], 0  ;;  %s424_s18 = smov [#allocation2]  }
   0x2   :  { %s23_s19 = sshll.u32 %s424_s18, 4  ;;  %s24_s19 = int_to_ptr.vmem [resolvable:$true] %s23_s19 }
   0x3   :  { %s388_s20 = scalar_lea.vmem %s24_s19, 2048  ;;  %p393_p1 = scmp.lt.s32.totalorder %s24_s19, %s24_s19 }
   0x4   :  { %p389_p0 = scmp.ne.s32.totalorder %s24_s19, %s388_s20  ;;  %p394_p2 = scmp.lt.s32.totalorder %s388_s20, %s388_s20 }
   0x6   :  { %p395_p3 = por %p394_p2, %p393_p1 }
   0x8   :  { %p396_p4 = pnand %p395_p3, %p389_p0 }
   0xa   :  { %399 = shalt.err (!%p396_p4)
}
   0xb   :  { %s425_s21 = smov 64   ;;  %s426_s22 = smov 4  }
   0xc   :  { %29 = dma.hbm_to_vmem [thread:$0]  %s485_s3, 2048, %s24_s19, [#allocation3], %s425_s21, %s425_s21, %s426_s22  }
   0xd   :  { %420 = dma.done.wait [#allocation3], 2048  }
   0xe   :  { %421 = vsyncadd [#allocation3], 4294965248  ;;  %v427_v0 = vmov 0   ;;  %v39_v1 = vld [vmem:[%s483_s1] sm:$0xff]  ;;  %vm61_vm0 = vcmask 1043456   ;;  %v37_v3 = vld [vmem:[%s482_s0 + $0x8] sm:$0xff]  ;;  %v42_v24 = vlaneseq }
   0xf   :  { %100 = vmatprep.mubr.bf16.mxu0 %v427_v0  ;;  %v36_v2 = vld [vmem:[%s482_s0] sm:$0xff]  ;;  %v313_v4 = vcombine.high %v39_v1, %v39_v1  ;;  %v312_v5 = vcombine.low %v39_v1, %v39_v1  ;;  %v364_v6 = vld [vmem:[#allocation2 + $0x78] sm:$0xff]   ;;  %v366_v10 = vld [vmem:[#allocation2 + $0x70] sm:$0xff]   ;;  %vm57_vm1 = vcmask 64512   ;;  %s428_s6 = smov [#allocation5]  }
  0x10   :  { %v365_v7 = vld [vmem:[#allocation2 + $0x38] sm:$0xff]   ;;  %v38_v9 = vpack.c.bf16 %v37_v3, %v36_v2  ;;  %333 = vmatprep.subr.bf16.mxu1 %v364_v6  ;;  %v367_v11 = vld [vmem:[#allocation2 + $0x30] sm:$0xff]   ;;  %v368_v12 = vld [vmem:[#allocation2 + $0x68] sm:$0xff]   ;;  %v43_v25 = vshrl.u32 %v42_v24, 7  ;;  %s300_s7 = sshll.u32 %s428_s6, 4  ;;  %s301_s7 = int_to_ptr.vmem [resolvable:$true] %s300_s7 }
  0x11   :  { %314 = vmatprep.subr.msk.bf16.mxu0 %vm61_vm0, %v313_v4  ;;  %v63_v8 = vsel %vm61_vm0, %v312_v5, 0  ;;  %334 = vmatpush3.bf16.msra.mxu1 %v365_v7  ;;  %v369_v13 = vld [vmem:[#allocation2 + $0x28] sm:$0xff]   ;;  %v370_v14 = vld [vmem:[#allocation2 + $0x60] sm:$0xff]   ;;  %v372_v16 = vld [vmem:[#allocation2 + $0x58] sm:$0xff]   ;;  %s400_s8 = scalar_lea.vmem %s301_s7, 256  ;;  %p405_p6 = scmp.lt.s32.totalorder %s301_s7, %s301_s7 }
  0x12   :  { %83 = vmatpush1.bf16.msra.mxu0 %v63_v8  ;;  %335 = vmatprep.subr.bf16.mxu1 %v366_v10  ;;  %v371_v15 = vld [vmem:[#allocation2 + $0x20] sm:$0xff]   ;;  %v373_v17 = vld [vmem:[#allocation2 + $0x18] sm:$0xff]   ;;  %v374_v18 = vld [vmem:[#allocation2 + $0x50] sm:$0xff]   ;;  %v48_v26 = vsub.s32 1, %v43_v25  ;;  %v44_v27 = vsub.s32 0, %v43_v25  ;;  %p401_p5 = scmp.ne.s32.totalorder %s301_s7, %s400_s8  ;;  %p406_p7 = scmp.lt.s32.totalorder %s400_s8, %s400_s8 }
  0x13   :  { %v375_v19 = vld [vmem:[#allocation2 + $0x10] sm:$0xff]   ;;  %v376_v20 = vld [vmem:[#allocation2 + $0x48] sm:$0xff]   ;;  %v378_v22 = vld [vmem:[#allocation2 + $0x40] sm:$0xff]  }
  0x14   :  { %v377_v21 = vld [vmem:[#allocation2 + $0x8] sm:$0xff]   ;;  %v379_v23 = vld [vmem:[#allocation2] sm:$0xff]   ;;  %p407_p8 = por %p406_p7, %p405_p6 }
  0x15   :  { %315 = vmatmul.mubr.msk.bf16.vlgmr.msra.gmra.mxu0 %vm57_vm1, %v38_v9  ;;  %336 = vmatpush3.bf16.msra.mxu1 %v367_v11  ;;  %v40_v28 = vld [vmem:[%s484_s2] sm:$0x3] }
  0x16   :  { %337 = vmatprep.subr.bf16.mxu1 %v368_v12  ;;  %v49_v30 = vrot.slane %v40_v28, %v48_v26  ;;  %v45_v31 = vrot.slane %v40_v28, %v44_v27  ;;  %v316_v46 = vld [vmem:[%s486_s4] ss:$0 sm:$0xff]  ;;  %p408_p9 = pnand %p407_p8, %p401_p5 }
  0x19   :  { %338 = vmatpush3.bf16.msra.mxu1 %v369_v13 }
  0x1a   :  { %339 = vmatprep.subr.bf16.mxu1 %v370_v14 }
  0x1d   :  { %340 = vmatpush3.bf16.msra.mxu1 %v371_v15 }
  0x1e   :  { %341 = vmatprep.subr.bf16.mxu1 %v372_v16 }
  0x21   :  { %342 = vmatpush3.bf16.msra.mxu1 %v373_v17 }
  0x22   :  { %343 = vmatprep.subr.bf16.mxu1 %v374_v18 }
  0x25   :  { %344 = vmatpush3.bf16.msra.mxu1 %v375_v19 }
  0x26   :  { %345 = vmatprep.subr.bf16.mxu1 %v376_v20 }
  0x29   :  { %346 = vmatpush3.bf16.msra.mxu1 %v377_v21 }
  0x2a   :  { %347 = vmatprep.subr.bf16.mxu1 %v378_v22 }
  0x2d   :  { %348 = vmatpush3.bf16.msra.mxu1 %v379_v23 }
  0xd5   :  { %v102_v29 = vpop.f32.mrf.mxu0 }
  0xd6   :  { %v103_v36 = vadd.f32 %v102_v29, %v45_v31 }
  0xd7   :  { %v104_v32 = vpop.f32.mrf.mxu0 }
  0xd8   :  { %v105_v34 = vadd.f32 %v104_v32, %v49_v30  ;;  %v111_v42 = vmax.f32 %v103_v36, 0.0 }
  0xd9   :  { %v106_v33 = vpop.f32.mrf.mxu0 }
  0xda   :  { %v107_v35 = vadd.f32 %v106_v33, %v45_v31  ;;  %v112_v40 = vmax.f32 %v105_v34, 0.0 }
  0xdb   :  { %v108_v37 = vpop.f32.mrf.mxu0 }
  0xdc   :  { %v109_v38 = vadd.f32 %v108_v37, %v49_v30  ;;  %v113_v39 = vmax.f32 %v107_v35, 0.0 }
  0xde   :  { %v114_v41 = vmax.f32 %v109_v38, 0.0  ;;  %v115_v44 = vpack.c.bf16 %v113_v39, %v111_v42 }
  0xe0   :  { %v116_v43 = vpack.c.bf16 %v114_v41, %v112_v40 }
  0xe2   :  { %284 = vmatprep.mubr.bf16.mxu1 %v116_v43 }
  0xe3   :  { %285 = vmatmul.mubr.bf16.vlgmr.msra.gmra.mxu1 %v115_v44 }
 0x1a3   :  { %v349_v45 = vpop.f32.mrf.mxu1 }
 0x1a5   :  { %v350_v47 = vpop.f32.mrf.mxu1 }
 0x1a6   :  { %v351_v48 = vadd.f32 %v350_v47, %v349_v45 }
 0x1a7   :  { %v352_v49 = vpop.f32.mrf.mxu1 }
 0x1a8   :  { %v287_v50 = vadd.f32 %v351_v48, %v316_v46 }
 0x1a9   :  { %v353_v51 = vpop.f32.mrf.mxu1 }
 0x1aa   :  { %293 = vst [vmem:[#allocation5] sm:$0xff] %v287_v50  ;;  %v354_v52 = vadd.f32 %v353_v51, %v352_v49 }
 0x1ac   :  { %v290_v53 = vadd.f32 %v354_v52, %v316_v46 }
 0x1ae   :  { %294 = vst [vmem:[#allocation5 + $0x8] sm:$0xff] %v290_v53 }
 0x1af   :  { %411 = shalt.err (!%p408_p9)
}
 0x1b0   :  { %s429_s4 = smov 128   ;;  %s430_s9 = smov 8  }
 0x1b1   :  { %306 = dma.vmem_to_hbm [thread:$0]  %s301_s7, 256, %s487_s5, [#allocation4], %s429_s4, %s429_s4, %s430_s9  }
 0x1b2   :  { %422 = dma.done.wait [#allocation4], 256  }
 0x1b3   :  { %423 = vsyncadd [#allocation4], 4294967040 }
 0x1b4   :  { %310 = vsyncpa [#allocation3], 1 }
 0x1b5   :  { %311 = vsyncpa [#allocation4], 1 }

</bundles_post_ra>
